<compile_context>
chip_gen: v7x
topology: tpu7x:2x2x1
jax: 0.10.0
libtpu: 0.0.40
codegen_flags: <defaults>
</compile_context>

<pallas_src>
import functools

import jax
import jax.numpy as jnp
from jax.experimental import pallas as pl
from jax.experimental.pallas import tpu as pltpu


def _round_up(n, m):
    return ((n + m - 1) // m) * m


def _head_kernel(x_ref, w1_ref, b1_ref, w3_ref, b3_ref, o_ref):
    # fc1 + ReLU  (bias add / ReLU are VPU work hidden under the MXU/DMA path)
    h = jnp.dot(x_ref[...], w1_ref[...], preferred_element_type=jnp.float32)
    h = jnp.maximum(h + b1_ref[...], 0.0)
    # fc3 + sigmoid (sigmoid -> EUP, free slot)
    logits = jnp.dot(h.astype(w3_ref.dtype), w3_ref[...],
                     preferred_element_type=jnp.float32)
    logits = logits + b3_ref[...]
    o_ref[...] = jax.nn.sigmoid(logits)


@functools.partial(jax.jit, static_argnames=("block_b", "use_bf16"))
def multilabel_task_head_forward(x, w1, b1, w3, b3, *, block_b=1024, use_bf16=False):
    """x: [B, input_size] f32. Returns sigmoid(relu(x@w1+b1) @ w3 + b3), shape [B, out]."""
    B, in_size = x.shape
    hid = w1.shape[1]
    out_size = w3.shape[1]

    # --- lane-dense padding of the feature dims (zero pad => identical math) ---
    hid_p = _round_up(hid, 128)
    out_p = _round_up(out_size, 128)
    w1_p = jnp.pad(w1.astype(jnp.float32), ((0, 0), (0, hid_p - hid)))
    b1_p = jnp.pad(b1.astype(jnp.float32), (0, hid_p - hid)).reshape(1, hid_p)
    w3_p = jnp.pad(w3.astype(jnp.float32), ((0, hid_p - hid), (0, out_p - out_size)))
    b3_p = jnp.pad(b3.astype(jnp.float32), (0, out_p - out_size)).reshape(1, out_p)

    # --- batch tiling: large tile, pad B up to a whole number of tiles ---
    tb = min(block_b, _round_up(B, 8))
    B_p = _round_up(B, tb)
    x_p = jnp.pad(x.astype(jnp.float32), ((0, B_p - B), (0, 0)))

    if use_bf16:
        # MXU-friendly inputs; accumulation stays f32 via preferred_element_type.
        x_p = x_p.astype(jnp.bfloat16)
        w1_p = w1_p.astype(jnp.bfloat16)
        w3_p = w3_p.astype(jnp.bfloat16)

    grid = (B_p // tb,)
    itemsize = jnp.dtype(x_p.dtype).itemsize
    flops = 2 * B_p * (in_size * hid_p + hid_p * out_p)
    bytes_accessed = (x_p.size * itemsize + w1_p.size * itemsize
                      + w3_p.size * itemsize
                      + b1_p.size * 4 + b3_p.size * 4
                      + B_p * out_p * 4)

    result = pl.pallas_call(
        _head_kernel,
        out_shape=jax.ShapeDtypeStruct((B_p, out_p), jnp.float32),
        grid=grid,
        in_specs=[
            # x tile marches over the batch; weights/biases stay VMEM-resident.
            pl.BlockSpec((tb, in_size), lambda i: (i, 0)),
            pl.BlockSpec((in_size, hid_p), lambda i: (0, 0)),
            pl.BlockSpec((1, hid_p), lambda i: (0, 0)),
            pl.BlockSpec((hid_p, out_p), lambda i: (0, 0)),
            pl.BlockSpec((1, out_p), lambda i: (0, 0)),
        ],
        out_specs=pl.BlockSpec((tb, out_p), lambda i: (i, 0)),
        compiler_params=pltpu.CompilerParams(
            dimension_semantics=("parallel",)),
        cost_estimate=pl.CostEstimate(
            flops=flops,
            transcendentals=B_p * out_p,
            bytes_accessed=bytes_accessed),
    )(x_p, w1_p, b1_p, w3_p, b3_p)

    # Strip batch padding and the padded output lanes.
    return result[:B, :out_size]


def init_params(key, input_size, output_size, hidden=48):
    # Deterministic init mimicking PyTorch Linear default: U(-1/sqrt(fan_in), 1/sqrt(fan_in)).
    k1, k2, k3, k4 = jax.random.split(key, 4)
    s1 = 1.0 / jnp.sqrt(input_size)
    s3 = 1.0 / jnp.sqrt(hidden)
    w1 = jax.random.uniform(k1, (input_size, hidden), jnp.float32, -s1, s1)
    b1 = jax.random.uniform(k2, (hidden,), jnp.float32, -s1, s1)
    w3 = jax.random.uniform(k3, (hidden, output_size), jnp.float32, -s3, s3)
    b3 = jax.random.uniform(k4, (output_size,), jnp.float32, -s3, s3)
    return w1, b1, w3, b3


if __name__ == "__main__":
    key = jax.random.PRNGKey(0)
    kx, kp = jax.random.split(key)

    batch, input_size, output_size = 8, 32, 16
    x = jax.random.normal(kx, (batch, input_size), jnp.float32)
    w1, b1, w3, b3 = init_params(kp, input_size, output_size)

    out = multilabel_task_head_forward(x, w1, b1, w3, b3)
    out = jax.block_until_ready(out)

    # Pure-JAX reference check of the forward semantics.
    ref = jax.nn.sigmoid(jnp.maximum(x @ w1 + b1, 0.0) @ w3 + b3)
    assert out.shape == (batch, output_size)
    assert jnp.allclose(out, ref, atol=1e-5, rtol=1e-5)

    # Also exercise a multi-tile batch (grid > 1) to check the tiling path.
    big_b = 2048
    xb = jax.random.normal(kx, (big_b, input_size), jnp.float32)
    out_big = jax.block_until_ready(
        multilabel_task_head_forward(xb, w1, b1, w3, b3, block_b=1024))
    ref_big = jax.nn.sigmoid(jnp.maximum(xb @ w1 + b1, 0.0) @ w3 + b3)
    assert out_big.shape == (big_b, output_size)
    assert jnp.allclose(out_big, ref_big, atol=1e-5, rtol=1e-5)

    print("KERNEL_OK")
</pallas_src>

<mosaic_0001>
module attributes {stable_mosaic.version = 11 : i64} {
  func.func @_head_kernel(%arg0: i32, %arg1: memref<8x32xf32, #tpu.memory_space<vmem>>, %arg2: memref<32x128xf32, #tpu.memory_space<vmem>>, %arg3: memref<1x128xf32, #tpu.memory_space<vmem>>, %arg4: memref<128x128xf32, #tpu.memory_space<vmem>>, %arg5: memref<1x128xf32, #tpu.memory_space<vmem>>, %arg6: memref<8x128xf32, #tpu.memory_space<vmem>>) attributes {dimension_semantics = [#tpu.dimension_semantics<parallel>], iteration_bounds = array<i64: 1>, scalar_prefetch = 0 : i64, scratch_operands = 0 : i64, tpu.core_type = #tpu.core_type<tc>, window_params = [{transform_indices = @transform_0, window_bounds = array<i64: 8, 32>}, {pipeline_mode = #tpu.pipeline_mode<synchronous>, transform_indices = @transform_1, window_bounds = array<i64: 32, 128>}, {pipeline_mode = #tpu.pipeline_mode<synchronous>, transform_indices = @transform_2, window_bounds = array<i64: 1, 128>}, {pipeline_mode = #tpu.pipeline_mode<synchronous>, transform_indices = @transform_3, window_bounds = array<i64: 128, 128>}, {pipeline_mode = #tpu.pipeline_mode<synchronous>, transform_indices = @transform_4, window_bounds = array<i64: 1, 128>}, {transform_indices = @transform_5, window_bounds = array<i64: 8, 128>}]} {
    %c0 = arith.constant 0 : index
    %c0_0 = arith.constant 0 : index
    %0 = vector.load %arg1[%c0, %c0_0] : memref<8x32xf32, #tpu.memory_space<vmem>>, vector<8x32xf32>
    %c0_1 = arith.constant 0 : index
    %c0_2 = arith.constant 0 : index
    %1 = vector.load %arg2[%c0_1, %c0_2] : memref<32x128xf32, #tpu.memory_space<vmem>>, vector<32x128xf32>
    %cst = arith.constant dense<0.000000e+00> : vector<8x128xf32>
    %2 = tpu.matmul %0, %1, %cst {dimension_numbers = #tpu.dot_dimension_numbers<[1], [0], [0], [1], [0, 0, 1, 1], [], []>} : vector<8x32xf32>, vector<32x128xf32>, vector<8x128xf32> -> vector<8x128xf32>
    %c0_3 = arith.constant 0 : index
    %c0_4 = arith.constant 0 : index
    %3 = vector.load %arg3[%c0_3, %c0_4] : memref<1x128xf32, #tpu.memory_space<vmem>>, vector<1x128xf32>
    %4 = vector.broadcast %3 : vector<1x128xf32> to vector<8x128xf32>
    %5 = arith.addf %2, %4 : vector<8x128xf32>
    %cst_5 = arith.constant 0.000000e+00 : f32
    %6 = vector.broadcast %cst_5 : f32 to vector<8x128xf32>
    %7 = arith.maximumf %5, %6 : vector<8x128xf32>
    %c0_6 = arith.constant 0 : index
    %c0_7 = arith.constant 0 : index
    %8 = vector.load %arg4[%c0_6, %c0_7] : memref<128x128xf32, #tpu.memory_space<vmem>>, vector<128x128xf32>
    %cst_8 = arith.constant dense<0.000000e+00> : vector<8x128xf32>
    %9 = tpu.matmul %7, %8, %cst_8 {dimension_numbers = #tpu.dot_dimension_numbers<[1], [0], [0], [1], [0, 0, 1, 1], [], []>} : vector<8x128xf32>, vector<128x128xf32>, vector<8x128xf32> -> vector<8x128xf32>
    %c0_9 = arith.constant 0 : index
    %c0_10 = arith.constant 0 : index
    %10 = vector.load %arg5[%c0_9, %c0_10] : memref<1x128xf32, #tpu.memory_space<vmem>>, vector<1x128xf32>
    %11 = vector.broadcast %10 : vector<1x128xf32> to vector<8x128xf32>
    %12 = arith.addf %9, %11 : vector<8x128xf32>
    %13 = arith.negf %12 : vector<8x128xf32>
    %14 = math.exp %13 : vector<8x128xf32>
    %cst_11 = arith.constant 1.000000e+00 : f32
    %15 = vector.broadcast %cst_11 : f32 to vector<8x128xf32>
    %16 = arith.addf %15, %14 : vector<8x128xf32>
    %17 = arith.divf %15, %16 : vector<8x128xf32>
    %c0_12 = arith.constant 0 : index
    %c0_13 = arith.constant 0 : index
    %18 = vector.load %arg6[%c0_12, %c0_13] : memref<8x128xf32, #tpu.memory_space<vmem>>, vector<8x128xf32>
    tpu.vector_store %arg6[%c0_12, %c0_13], %17 {strides = array<i32>} : memref<8x128xf32, #tpu.memory_space<vmem>>, vector<8x128xf32>,
    return
  }
  func.func @transform_0(%arg0: i32) -> (i32, i32) {
    %c0_i32 = arith.constant 0 : i32
    %c0_i32_0 = arith.constant 0 : i32
    return %arg0, %c0_i32 : i32, i32
  }
  func.func @transform_1(%arg0: i32) -> (i32, i32) {
    %c0_i32 = arith.constant 0 : i32
    %c0_i32_0 = arith.constant 0 : i32
    %c0_i32_1 = arith.constant 0 : i32
    return %c0_i32, %c0_i32_0 : i32, i32
  }
  func.func @transform_2(%arg0: i32) -> (i32, i32) {
    %c0_i32 = arith.constant 0 : i32
    %c0_i32_0 = arith.constant 0 : i32
    %c0_i32_1 = arith.constant 0 : i32
    return %c0_i32, %c0_i32_0 : i32, i32
  }
  func.func @transform_3(%arg0: i32) -> (i32, i32) {
    %c0_i32 = arith.constant 0 : i32
    %c0_i32_0 = arith.constant 0 : i32
    %c0_i32_1 = arith.constant 0 : i32
    return %c0_i32, %c0_i32_0 : i32, i32
  }
  func.func @transform_4(%arg0: i32) -> (i32, i32) {
    %c0_i32 = arith.constant 0 : i32
    %c0_i32_0 = arith.constant 0 : i32
    %c0_i32_1 = arith.constant 0 : i32
    return %c0_i32, %c0_i32_0 : i32, i32
  }
  func.func @transform_5(%arg0: i32) -> (i32, i32) {
    %c0_i32 = arith.constant 0 : i32
    %c0_i32_0 = arith.constant 0 : i32
    return %arg0, %c0_i32 : i32, i32
  }
}

</mosaic_0001>

<bundles_post_ra>
// kernel: multilabel_task_head_forward.1
= control target key start
LH: loop header
LB: loop body
LE: loop exit
PB: predicated region body
PF: predicated region fallthrough
CT: control target
= control target key end

     0   :  { %v356_v3 = vmov 0.0|0.0   ;;  %vm357_vm0 = vmmov 0   ;;  %v358_v6 = vmov 0.0   ;;  %s471_s0 = inlined_call_operand.vmem [shape: f32[8,32], index: 0, kind: input, shape index: {}]   ;;  %s472_s1 = inlined_call_operand.vmem [shape: f32[32,128], index: 1, kind: input, shape index: {}]   ;;  %s473_s2 = inlined_call_operand.vmem [shape: f32[1,128], index: 2, kind: input, shape index: {}]   ;;  %s474_s3 = inlined_call_operand.vmem [shape: f32[128,128], index: 3, kind: input, shape index: {}]   ;;  %s475_s4 = inlined_call_operand.vmem [shape: f32[1,128], index: 4, kind: input, shape index: {}]   ;;  %s476_s5 = inlined_call_operand.hbm [shape: f32[8,128], index: 5, kind: output, shape index: {}]  }
   0x1   :  { %v22_v0 = vld [vmem:[%s472_s1] sm:$0xff]  ;;  %v23_v1 = vld [vmem:[%s472_s1 + $0x8] sm:$0xff]  ;;  %v24_v2 = vld [vmem:[%s472_s1 + $0x10] sm:$0xff]  ;;  %294 = vmatprep.subr.bf16.mxu0 %v356_v3  ;;  %256 = vmatprep.mubr.msk.f32.mxu0 %vm357_vm0, %v358_v6 }
   0x2   :  { %v295_v4 = vpack.c.bf16 %v23_v1, %v22_v0  ;;  %v25_v5 = vld [vmem:[%s472_s1 + $0x18] sm:$0xff]  ;;  %v108_v7 = vld [vmem:[%s474_s3] sm:$0xff]  ;;  %300 = vmatprep.subr.bf16.mxu1 %v356_v3  ;;  %v109_v8 = vld [vmem:[%s474_s3 + $0x8] sm:$0xff]  ;;  %291 = vmatprep.mubr.msk.f32.mxu1 %vm357_vm0, %v358_v6 }
   0x3   :  { %v110_v9 = vld [vmem:[%s474_s3 + $0x10] sm:$0xff]  ;;  %v111_v10 = vld [vmem:[%s474_s3 + $0x18] sm:$0xff]  ;;  %v298_v11 = vpack.c.bf16 %v25_v5, %v24_v2  ;;  %v301_v12 = vpack.c.bf16 %v109_v8, %v108_v7  ;;  %v112_v14 = vld [vmem:[%s474_s3 + $0x20] sm:$0xff] }
   0x4   :  { %296 = vmatpush3.bf16.msra.mxu0 %v295_v4  ;;  %v304_v13 = vpack.c.bf16 %v111_v10, %v110_v9  ;;  %v113_v15 = vld [vmem:[%s474_s3 + $0x28] sm:$0xff] }
   0x5   :  { %297 = vmatprep.subr.bf16.mxu0 %v356_v3  ;;  %302 = vmatpush3.bf16.msra.mxu1 %v301_v12 }
   0x6   :  { %303 = vmatprep.subr.bf16.mxu1 %v356_v3 }
   0x7   :  { %10 = vsyncpa [#allocation3], 0  ;;  %v21_v16 = vld [vmem:[%s471_s0] sm:$0xff]  ;;  %vm33_vm1 = vcmask 261120   ;;  %v307_v17 = vpack.c.bf16 %v113_v15, %v112_v14  ;;  %v114_v18 = vld [vmem:[%s474_s3 + $0x30] sm:$0xff] }
   0x8   :  { %299 = vmatpush3.bf16.msra.mxu0 %v298_v11  ;;  %v115_v19 = vld [vmem:[%s474_s3 + $0x38] sm:$0xff]  ;;  %v116_v21 = vld [vmem:[%s474_s3 + $0x40] sm:$0xff]  ;;  %v117_v22 = vld [vmem:[%s474_s3 + $0x48] sm:$0xff] }
   0x9   :  { %305 = vmatpush3.bf16.msra.mxu1 %v304_v13  ;;  %v310_v20 = vpack.c.bf16 %v115_v19, %v114_v18  ;;  %v313_v23 = vpack.c.bf16 %v117_v22, %v116_v21  ;;  %v118_v24 = vld [vmem:[%s474_s3 + $0x50] sm:$0xff]  ;;  %v119_v25 = vld [vmem:[%s474_s3 + $0x58] sm:$0xff]  ;;  %v120_v27 = vld [vmem:[%s474_s3 + $0x60] sm:$0xff] }
   0xa   :  { %306 = vmatprep.subr.bf16.mxu1 %v356_v3  ;;  %v316_v26 = vpack.c.bf16 %v119_v25, %v118_v24  ;;  %v121_v28 = vld [vmem:[%s474_s3 + $0x68] sm:$0xff]  ;;  %v122_v30 = vld [vmem:[%s474_s3 + $0x70] sm:$0xff]  ;;  %v123_v31 = vld [vmem:[%s474_s3 + $0x78] sm:$0xff]  ;;  %s359_s3 = smov [#allocation2]  }
   0xb   :  { %257 = vmatmul.mubr.msk.f32.vlgmr.msra.gmra.mrb[0].mxu0 %vm33_vm1, %v21_v16  ;;  %v319_v29 = vpack.c.bf16 %v121_v28, %v120_v27  ;;  %v322_v32 = vpack.c.bf16 %v123_v31, %v122_v30  ;;  %v222_v33 = vld [vmem:[%s473_s2] ss:$0 sm:$0xff]  ;;  %s214_s11 = sshll.u32 %s359_s3, 4  ;;  %s215_s11 = int_to_ptr.vmem [resolvable:$true] %s214_s11 }
   0xc   :  { %v224_v38 = vld [vmem:[%s475_s4] ss:$0 sm:$0xff]  ;;  %s332_s2 = scalar_lea.vmem %s215_s11, 128  ;;  %p337_p1 = scmp.lt.s32.totalorder %s215_s11, %s215_s11 }
   0xd   :  { %308 = vmatpush3.bf16.msra.mxu1 %v307_v17  ;;  %p333_p0 = scmp.ne.s32.totalorder %s215_s11, %s332_s2  ;;  %p338_p2 = scmp.lt.s32.totalorder %s332_s2, %s332_s2 }
   0xe   :  { %309 = vmatprep.subr.bf16.mxu1 %v356_v3 }
   0xf   :  { %p339_p3 = por %p338_p2, %p337_p1 }
  0x11   :  { %311 = vmatpush3.bf16.msra.mxu1 %v310_v20  ;;  %p340_p4 = pnand %p339_p3, %p333_p0 }
  0x12   :  { %312 = vmatprep.subr.bf16.mxu1 %v356_v3 }
  0x15   :  { %314 = vmatpush3.bf16.msra.mxu1 %v313_v23 }
  0x16   :  { %315 = vmatprep.subr.bf16.mxu1 %v356_v3 }
  0x19   :  { %317 = vmatpush3.bf16.msra.mxu1 %v316_v26 }
  0x1a   :  { %318 = vmatprep.subr.bf16.mxu1 %v356_v3 }
  0x1d   :  { %320 = vmatpush3.bf16.msra.mxu1 %v319_v29 }
  0x1e   :  { %321 = vmatprep.subr.bf16.mxu1 %v356_v3 }
  0x21   :  { %323 = vmatpush3.bf16.msra.mxu1 %v322_v32 }
  0xde   :  { %v103_v34 = vpop.f32.mrb[0].mxu0 }
  0xdf   :  { %v104_v35 = vadd.f32 %v222_v33, %v103_v34  ;;  %v258_v36 = vpop.f32.mrb[1].mxu0 }
  0xe1   :  { %v107_v37 = vmax.f32 %v104_v35, 0.0 }
  0xe3   :  { %292 = vmatmul.mubr.f32.vlgmr.msra.gmra.mrb[0].mxu1 %v107_v37 }
 0x1b6   :  { %v197_v39 = vpop.f32.mrb[0].mxu1 }
 0x1b7   :  { %v198_v40 = vadd.f32 %v224_v38, %v197_v39  ;;  %v293_v41 = vpop.f32.mrb[1].mxu1 }
 0x1b9   :  { %v225_v42 = vmul.f32 -1.442695, %v198_v40 }
 0x1bb   :  { %328 = vpow2.f32 %v225_v42 }
 0x1c5   :  { %v329_v43 = vpop.eup %328 }
 0x1c6   :  { %v204_v44 = vadd.f32 1.0, %v329_v43 }
 0x1c8   :  { %330 = vrcp.f32 %v204_v44 }
 0x1d2   :  { %v331_v45 = vpop.eup %330 }
 0x1d3   :  { %207 = vst [vmem:[#allocation2] sm:$0xff] %v331_v45 }
 0x1d4   :  { %343 = shalt.err (!%p340_p4)
}
 0x1d5   :  { %s344_s13 = scalar_lea.hbm %s476_s5, 128 }
 0x1d6   :  { %p345_p5 = scmp.ne.s32.totalorder %s476_s5, %s344_s13  ;;  %p348_p6 = scmp.lt.u32.totalorder %s344_s13, %s476_s5 }
 0x1d8   :  { %p350_p7 = pnand %p348_p6, %p345_p5 }
 0x1da   :  { %353 = shalt.err (!%p350_p7)
}
 0x1db   :  { %217 = dma.vmem_to_hbm [thread:$0]  %s215_s11, 128, %s476_s5, [#allocation3]  }
 0x1dc   :  { %354 = dma.done.wait [#allocation3], 128  }
 0x1dd   :  { %355 = vsyncadd [#allocation3], 4294967168 }
 0x1de   :  { %221 = vsyncpa [#allocation3], 1 }

</bundles_post_ra>
